<compile_context>
chip_gen: v7x
topology: tpu7x:2x2x1
jax: 0.10.0
libtpu: 0.0.40
codegen_flags: <defaults>
</compile_context>

<pallas_src>
import jax
import jax.numpy as jnp
from jax.experimental import pallas as pl
from jax.experimental.pallas import tpu as pltpu


_TARGET_TILE_BYTES = 4 * 1024 * 1024      # ~4 MiB per input tile
_VMEM_LIMIT_BYTES = 32 * 1024 * 1024      # 2 bufs x (in + out) x 4 MiB + headroom
_MIN_KERNEL_ELEMS = 1 << 20               # below this, plain fused XLA wins


def _act_kernel(x_ref, o_ref):
    x = x_ref[...]
    if x_ref.dtype != jnp.bfloat16:
        # f32 (and other dtypes) compute in f32; bf16 stays native on v6e/v7x.
        x = x.astype(jnp.float32)
    # 2*sigmoid(x) == 1 + tanh(x/2): single EUP op + one VALU add per element.
    o_ref[...] = (1.0 + jnp.tanh(0.5 * x)).astype(o_ref.dtype)


def _choose_tile_rows(rows, cols, itemsize):
    """Largest tile that (a) targets ~4 MiB and (b) leaves >= 2 grid steps."""
    if rows <= 8:
        return rows                                        # full extent: always legal
    target = max(8, (_TARGET_TILE_BYTES // (cols * itemsize)) // 8 * 8)
    half = max(8, (((rows + 1) // 2) + 7) // 8 * 8)        # ceil(rows/2) -> mult of 8
    return min(target, half)                               # guarantees grid >= 2


def _act_2d(x2d):
    rows, cols = x2d.shape
    tr = _choose_tile_rows(rows, cols, x2d.dtype.itemsize)
    grid = (pl.cdiv(rows, tr),)
    n = rows * cols
    return pl.pallas_call(
        _act_kernel,
        out_shape=jax.ShapeDtypeStruct((rows, cols), x2d.dtype),
        grid_spec=pltpu.PrefetchScalarGridSpec(
            num_scalar_prefetch=0,
            grid=grid,
            in_specs=[pl.BlockSpec((tr, cols), lambda i: (i, 0))],
            out_specs=pl.BlockSpec((tr, cols), lambda i: (i, 0)),
        ),
        compiler_params=pltpu.CompilerParams(
            dimension_semantics=("parallel",),
            vmem_limit_bytes=_VMEM_LIMIT_BYTES,
        ),
        cost_estimate=pl.CostEstimate(
            flops=2 * n,
            transcendentals=n,
            bytes_accessed=2 * n * x2d.dtype.itemsize,
        ),
    )(x2d)


def act_op(x, *, min_kernel_elems=_MIN_KERNEL_ELEMS):
    """Elementwise 2*sigmoid(x) via a lane-dense Pallas TPU kernel."""
    n = x.size
    if n == 0 or n < min_kernel_elems:
        # Launch + 1-step grid overhead beats any gain on tiny tensors.
        return (2.0 * jax.nn.sigmoid(x)).astype(x.dtype)

    flat = x.reshape(-1)

    # Pick a lane-dense column count (multiple of 128) that divides n exactly so
    # the reshape below is a free relayout -- no pad / slice HBM round-trips.
    cols = None
    for c in (1024, 896, 768, 640, 512, 384, 256, 128):
        if n % c == 0:
            cols = c
            break

    if cols is not None:
        out2d = _act_2d(flat.reshape(n // cols, cols))
        return out2d.reshape(x.shape)

    # Rare: n is not a multiple of 128. Kernel on the main slab, plain-jnp tail.
    cols = 1024
    rows = n // cols
    if rows == 0:
        return (2.0 * jax.nn.sigmoid(x)).astype(x.dtype)
    split = rows * cols
    out_main = _act_2d(flat[:split].reshape(rows, cols)).reshape(-1)
    out_tail = (2.0 * jax.nn.sigmoid(flat[split:])).astype(x.dtype)
    return jnp.concatenate([out_main, out_tail]).reshape(x.shape)


if __name__ == "__main__":
    key = jax.random.PRNGKey(0)
    k1, k2, k3 = jax.random.split(key, 3)

    # 1) Small NCHW VAE feature map, forced through the Pallas kernel.
    x_small = jax.random.normal(k1, (2, 4, 16, 16), dtype=jnp.float32)
    y_small = jax.block_until_ready(act_op(x_small, min_kernel_elems=0))
    ref_small = 2.0 * jax.nn.sigmoid(x_small)
    assert y_small.shape == x_small.shape and y_small.dtype == x_small.dtype
    assert jnp.allclose(y_small, ref_small, atol=1e-5, rtol=1e-5)

    # 2) Multi-step grid path (divisible size, >= 2 grid blocks).
    x_big = jax.random.normal(k2, (2, 8, 64, 128), dtype=jnp.float32)
    y_big = jax.block_until_ready(act_op(x_big, min_kernel_elems=0))
    assert jnp.allclose(y_big, 2.0 * jax.nn.sigmoid(x_big), atol=1e-5, rtol=1e-5)

    # 3) Non-divisible size: kernel on main slab + plain-jnp tail.
    x_odd = jax.random.normal(k3, (3, 5, 7, 11), dtype=jnp.float32)
    y_odd = jax.block_until_ready(act_op(x_odd, min_kernel_elems=0))
    assert y_odd.shape == x_odd.shape
    assert jnp.allclose(y_odd, 2.0 * jax.nn.sigmoid(x_odd), atol=1e-5, rtol=1e-5)

    # 4) Default threshold path (tiny input -> fused XLA fallback).
    y_fb = jax.block_until_ready(act_op(x_small))
    assert jnp.allclose(y_fb, ref_small, atol=1e-5, rtol=1e-5)

    print("KERNEL_OK")
</pallas_src>

<mosaic_0001>
module attributes {stable_mosaic.version = 11 : i64} {
  func.func @_act_kernel(%arg0: i32, %arg1: memref<2x1024xf32, #tpu.memory_space<vmem>>, %arg2: memref<2x1024xf32, #tpu.memory_space<vmem>>) attributes {dimension_semantics = [#tpu.dimension_semantics<parallel>], iteration_bounds = array<i64: 1>, scalar_prefetch = 0 : i64, scratch_operands = 0 : i64, tpu.core_type = #tpu.core_type<tc>, window_params = [{transform_indices = @transform_0, window_bounds = array<i64: 2, 1024>}, {transform_indices = @transform_1, window_bounds = array<i64: 2, 1024>}]} {
    %c0 = arith.constant 0 : index
    %c0_0 = arith.constant 0 : index
    %0 = vector.load %arg1[%c0, %c0_0] : memref<2x1024xf32, #tpu.memory_space<vmem>>, vector<2x1024xf32>
    %cst = arith.constant 5.000000e-01 : f32
    %1 = vector.broadcast %cst : f32 to vector<2x1024xf32>
    %2 = arith.mulf %1, %0 : vector<2x1024xf32>
    %3 = math.tanh %2 : vector<2x1024xf32>
    %cst_1 = arith.constant 1.000000e+00 : f32
    %4 = vector.broadcast %cst_1 : f32 to vector<2x1024xf32>
    %5 = arith.addf %4, %3 : vector<2x1024xf32>
    %c0_2 = arith.constant 0 : index
    %c0_3 = arith.constant 0 : index
    %6 = vector.load %arg2[%c0_2, %c0_3] : memref<2x1024xf32, #tpu.memory_space<vmem>>, vector<2x1024xf32>
    tpu.vector_store %arg2[%c0_2, %c0_3], %5 {strides = array<i32>} : memref<2x1024xf32, #tpu.memory_space<vmem>>, vector<2x1024xf32>,
    return
  }
  func.func @transform_0(%arg0: i32) -> (i32, i32) {
    %c0_i32 = arith.constant 0 : i32
    %c0_i32_0 = arith.constant 0 : i32
    return %arg0, %c0_i32 : i32, i32
  }
  func.func @transform_1(%arg0: i32) -> (i32, i32) {
    %c0_i32 = arith.constant 0 : i32
    %c0_i32_0 = arith.constant 0 : i32
    return %arg0, %c0_i32 : i32, i32
  }
}

</mosaic_0001>

<bundles_post_ra>
// kernel: tpu_custom_call.1
= control target key start
LH: loop header
LB: loop body
LE: loop exit
PB: predicated region body
PF: predicated region fallthrough
CT: control target
= control target key end

     0   :  { %6 = vsyncpa [#allocation3], 0  ;;  %s136_s0 = inlined_call_operand.hbm [shape: f32[2,1024], index: 0, kind: input, shape index: {}]   ;;  %s137_s1 = inlined_call_operand.hbm [shape: f32[2,1024], index: 1, kind: output, shape index: {}]  }
   0x1   :  { %7 = vsyncpa [#allocation4], 0  ;;  %s100_s6 = smov [#allocation2]   ;;  %s52_s10 = scalar_lea.hbm %s136_s0, 256 }
   0x2   :  { %s14_s7 = sshll.u32 %s100_s6, 4  ;;  %p53_p0 = scmp.ne.s32.totalorder %s136_s0, %s52_s10  ;;  %s15_s7 = int_to_ptr.vmem [resolvable:$true] %s14_s7 }
   0x3   :  { %p56_p1 = scmp.lt.u32.totalorder %s52_s10, %s136_s0 }
   0x5   :  { %p58_p2 = pnand %p56_p1, %p53_p0 }
   0x7   :  { %61 = shalt.err (!%p58_p2)
}
   0x8   :  { %s62_s15 = scalar_lea.vmem %s15_s7, 256  ;;  %p67_p4 = scmp.lt.s32.totalorder %s15_s7, %s15_s7 }
   0x9   :  { %p63_p3 = scmp.ne.s32.totalorder %s15_s7, %s62_s15  ;;  %p68_p5 = scmp.lt.s32.totalorder %s62_s15, %s62_s15 }
   0xb   :  { %p69_p6 = por %p68_p5, %p67_p4 }
   0xd   :  { %p70_p7 = pnand %p69_p6, %p63_p3 }
   0xf   :  { %73 = shalt.err (!%p70_p7)
}
  0x10   :  { %17 = dma.hbm_to_vmem [thread:$0]  %s136_s0, 256, %s15_s7, [#allocation3]  }
  0x11   :  { %96 = dma.done.wait [#allocation3], 256  }
  0x12   :  { %97 = vsyncadd [#allocation3], 4294967040  ;;  %v21_v0 = vld [vmem:[#allocation2] sm:$0xff]  ;;  %v22_v1 = vld [vmem:[#allocation2 + $0x8] sm:$0xff]  ;;  %s101_s18 = smov [#allocation5]  }
  0x13   :  { %v23_v2 = vmul.f32 0.5, %v21_v0  ;;  %v24_v3 = vmul.f32 0.5, %v22_v1  ;;  %s37_s19 = sshll.u32 %s101_s18, 4  ;;  %s38_s19 = int_to_ptr.vmem [resolvable:$true] %s37_s19 }
  0x14   :  { %s74_s20 = scalar_lea.vmem %s38_s19, 256  ;;  %p79_p9 = scmp.lt.s32.totalorder %s38_s19, %s38_s19 }
  0x15   :  { %48 = vtanh.f32 %v23_v2  ;;  %p75_p8 = scmp.ne.s32.totalorder %s38_s19, %s74_s20  ;;  %p80_p10 = scmp.lt.s32.totalorder %s74_s20, %s74_s20 }
  0x16   :  { %50 = vtanh.f32 %v24_v3 }
  0x17   :  { %p81_p11 = por %p80_p10, %p79_p9 }
  0x19   :  { %p82_p12 = pnand %p81_p11, %p75_p8 }
  0x1f   :  { %v49_v4 = vpop.eup %48 }
  0x20   :  { %v51_v5 = vpop.eup %50  ;;  %v27_v6 = vadd.f32 1.0, %v49_v4 }
  0x21   :  { %v28_v7 = vadd.f32 1.0, %v51_v5 }
  0x22   :  { %29 = vst [vmem:[#allocation5] sm:$0xff] %v27_v6 }
  0x23   :  { %30 = vst [vmem:[#allocation5 + $0x8] sm:$0xff] %v28_v7 }
  0x24   :  { %85 = shalt.err (!%p82_p12)
}
  0x25   :  { %s86_s22 = scalar_lea.hbm %s137_s1, 256 }
  0x26   :  { %p87_p13 = scmp.ne.s32.totalorder %s137_s1, %s86_s22  ;;  %p90_p0 = scmp.lt.u32.totalorder %s86_s22, %s137_s1 }
  0x28   :  { %p92_p1 = pnand %p90_p0, %p87_p13 }
  0x2a   :  { %95 = shalt.err (!%p92_p1)
}
  0x2b   :  { %40 = dma.vmem_to_hbm [thread:$0]  %s38_s19, 256, %s137_s1, [#allocation4]  }
  0x2c   :  { %98 = dma.done.wait [#allocation4], 256  }
  0x2d   :  { %99 = vsyncadd [#allocation4], 4294967040 }
  0x2e   :  { %44 = vsyncpa [#allocation3], 1 }
  0x2f   :  { %45 = vsyncpa [#allocation4], 1 }

</bundles_post_ra>
